<compile_context>
chip_gen: v7x
topology: tpu7x:2x2x1
jax: 0.10.0
libtpu: 0.0.40
codegen_flags: <defaults>
</compile_context>

<pallas_src>
import numpy as np

import jax
import jax.numpy as jnp
from jax.experimental import pallas as pl
from jax.experimental.pallas import tpu as pltpu


def _data_encoder_mlp_kernel(val_idx_ref, val_f_ref, is_cont_ref,
                             w_emb_ref, b_emb_ref,
                             w1_ref, b1_ref, w2_ref, b2_ref,
                             out_ref):
    # w1_ref: (A, H, M) == first Linear weight reshaped so that flat index a*H+h -> [a, h, :].
    A, H, M = w1_ref.shape

    # ---- Encode each attribute slot -> patient_max tile (A, H) -------------------------
    lane = jax.lax.broadcasted_iota(jnp.int32, (A, H), 1)            # (A, H)
    # one_hot(int(value)); a val_idx of -1 (attribute missing / continuous) yields a zero row,
    # matching the torch zeros-initialized patient_max.
    onehot = (lane == val_idx_ref[...]).astype(jnp.float32)          # (A, H)
    # continuous_embedding: Linear(1, H)(value) = value * W[:,0] + b
    cont = val_f_ref[...] * w_emb_ref[...] + b_emb_ref[...]          # (A,1)*(1,H)+(1,H)->(A,H)
    pm = jnp.where(is_cont_ref[...] != 0, cont, onehot)              # (A, H)

    # ---- MLP: relu(flatten(pm) @ W1 + b1) @ W2 + b2 -------------------------------------
    # flatten(pm) @ W1  ==  sum_a  pm[a, :] @ W1[a*H:(a+1)*H, :]
    h = b1_ref[...].astype(jnp.float32)                              # (1, M)
    for a in range(A):                                               # static unroll (A small)
        h = h + jnp.dot(pm[a:a + 1, :], w1_ref[a],
                        preferred_element_type=jnp.float32)
    h = jnp.maximum(h, 0.0)                                          # ReLU
    out = jnp.dot(h, w2_ref[...], preferred_element_type=jnp.float32) + b2_ref[...]
    out_ref[...] = out.astype(out_ref.dtype)


def data_encoder_mlp(val_idx, val_f, is_cont, w_emb, b_emb, w1, b1, w2, b2):
    """Fused DataEncoder.forward (train_way='mlp') for a single patient.

    val_idx : (A, 1) int32   -- one-hot index for categorical attrs, -1 if missing/continuous
    val_f   : (A, 1) float32 -- raw value for continuous attrs
    is_cont : (A, 1) int32   -- 1 if the attribute is continuous
    w_emb   : (1, H), b_emb: (1, H)    -- continuous_embedding Linear(1, H)
    w1      : (A, H, M), b1: (1, M)    -- mlp[0] Linear(A*H, M) (weight reshaped)
    w2      : (M, O), b2: (1, O)       -- mlp[2] Linear(M, O)
    returns (1, O) float32
    """
    O = w2.shape[1]
    vmem = lambda: pl.BlockSpec(memory_space=pltpu.MemorySpace.VMEM)
    return pl.pallas_call(
        _data_encoder_mlp_kernel,
        out_shape=jax.ShapeDtypeStruct((1, O), jnp.float32),
        in_specs=[vmem() for _ in range(9)],
        out_specs=vmem(),
    )(val_idx, val_f, is_cont, w_emb, b_emb, w1, b1, w2, b2)


# ---------------------------- host-side preprocessing (untranslatable) -------------------
def preprocess(patient_info, attribute_list, continuous_attributes):
    """Mirror the torch forward's string parsing into numeric tensors (single patient)."""
    assert len(patient_info) == 1, "module's .view((1,-1)) assumes a single patient"
    A = len(attribute_list)
    val_idx = np.full((A, 1), -1, dtype=np.int32)     # -1 -> zero row (missing attribute)
    val_f = np.zeros((A, 1), dtype=np.float32)
    is_cont = np.zeros((A, 1), dtype=np.int32)
    for info in patient_info[0]:
        attribute, value = info.split(':')
        index = attribute_list.index(attribute)
        if attribute not in continuous_attributes:
            val_idx[index, 0] = int(value)
            is_cont[index, 0] = 0
        else:
            is_cont[index, 0] = 1
            val_f[index, 0] = float(value)
    return jnp.asarray(val_idx), jnp.asarray(val_f), jnp.asarray(is_cont)


# ---------------------------- pure reference mirroring the torch module ------------------
def data_encoder_ref(patient_info, attribute_list, continuous_attributes,
                     hidden_dim, w_emb, b_emb, w1_flat, b1, w2, b2):
    w_emb = np.asarray(w_emb); b_emb = np.asarray(b_emb)
    w1_flat = np.asarray(w1_flat); b1 = np.asarray(b1)
    w2 = np.asarray(w2); b2 = np.asarray(b2)
    B, A = len(patient_info), len(attribute_list)
    pm = np.zeros((B, A, hidden_dim), dtype=np.float32)
    for i in range(B):
        for info in patient_info[i]:
            attribute, value = info.split(':')
            index = attribute_list.index(attribute)
            if attribute not in continuous_attributes:
                oh = np.zeros(hidden_dim, dtype=np.float32)
                oh[int(value)] = 1.0
                pm[i, index] = oh
            else:
                pm[i, index] = float(value) * w_emb[0] + b_emb[0]
    x = pm.reshape(1, -1)
    h = np.maximum(x @ w1_flat + b1, 0.0)
    return h @ w2 + b2


if __name__ == "__main__":
    # Small shapes consistent with the module's defaults.
    hidden_dim = 32           # self.hidden_dim
    mlp_hidden_dim = 16       # self.mlp_hidden_dim
    output_dim = 8            # self.mlp_output_dim
    attribute_list = ["gender", "age", "blood_type", "bmi"]
    continuous_attributes = ["age", "bmi"]
    A = len(attribute_list)
    # Single patient's AVP list; "blood_type" intentionally missing -> zero row.
    patient_info = [["gender:1", "age:63.0", "bmi:27.4"]]

    # Deterministic weights.
    key = jax.random.PRNGKey(0)
    k1, k2, k3, k4, k5, k6 = jax.random.split(key, 6)
    w_emb = 0.1 * jax.random.normal(k1, (1, hidden_dim), dtype=jnp.float32)
    b_emb = 0.1 * jax.random.normal(k2, (1, hidden_dim), dtype=jnp.float32)
    w1_flat = 0.1 * jax.random.normal(k3, (A * hidden_dim, mlp_hidden_dim), dtype=jnp.float32)
    b1 = 0.1 * jax.random.normal(k4, (1, mlp_hidden_dim), dtype=jnp.float32)
    w2 = 0.1 * jax.random.normal(k5, (mlp_hidden_dim, output_dim), dtype=jnp.float32)
    b2 = 0.1 * jax.random.normal(k6, (1, output_dim), dtype=jnp.float32)
    w1 = w1_flat.reshape(A, hidden_dim, mlp_hidden_dim)   # flat index a*H+h -> [a, h, :]

    # Host-side parse (string handling has no kernel equivalent).
    val_idx, val_f, is_cont = preprocess(patient_info, attribute_list, continuous_attributes)

    out = data_encoder_mlp(val_idx, val_f, is_cont, w_emb, b_emb, w1, b1, w2, b2)
    out = jax.block_until_ready(out)

    ref = data_encoder_ref(patient_info, attribute_list, continuous_attributes,
                           hidden_dim, w_emb, b_emb, w1_flat, b1, w2, b2)

    assert out.shape == (1, output_dim)
    assert np.allclose(np.asarray(out), ref, atol=1e-5, rtol=1e-5), "mismatch vs reference"

    print("KERNEL_OK")
</pallas_src>

<mosaic_0001>
module attributes {stable_mosaic.version = 11 : i64} {
  func.func @_data_encoder_mlp_kernel(%arg0: memref<4x1xi32, #tpu.memory_space<vmem>>, %arg1: memref<4x1xf32, #tpu.memory_space<vmem>>, %arg2: memref<4x1xi32, #tpu.memory_space<vmem>>, %arg3: memref<1x32xf32, #tpu.memory_space<vmem>>, %arg4: memref<1x32xf32, #tpu.memory_space<vmem>>, %arg5: memref<4x32x16xf32, #tpu.memory_space<vmem>>, %arg6: memref<1x16xf32, #tpu.memory_space<vmem>>, %arg7: memref<16x8xf32, #tpu.memory_space<vmem>>, %arg8: memref<1x8xf32, #tpu.memory_space<vmem>>, %arg9: memref<1x8xf32, #tpu.memory_space<vmem>>) attributes {dimension_semantics = [], scalar_prefetch = 0 : i64, scratch_operands = 0 : i64, tpu.core_type = #tpu.core_type<tc>} {
    %0 = tpu.iota {dimensions = array<i32: 1>} : vector<4x32xi32>
    %c0 = arith.constant 0 : index
    %c0_0 = arith.constant 0 : index
    %1 = vector.load %arg0[%c0, %c0_0] : memref<4x1xi32, #tpu.memory_space<vmem>>, vector<4x1xi32>
    %2 = vector.broadcast %1 : vector<4x1xi32> to vector<4x32xi32>
    %3 = arith.cmpi eq, %0, %2 : vector<4x32xi32>
    %4 = arith.extui %3 : vector<4x32xi1> to vector<4x32xi32>
    %5 = arith.sitofp %4 : vector<4x32xi32> to vector<4x32xf32>
    %c0_1 = arith.constant 0 : index
    %c0_2 = arith.constant 0 : index
    %6 = vector.load %arg1[%c0_1, %c0_2] : memref<4x1xf32, #tpu.memory_space<vmem>>, vector<4x1xf32>
    %c0_3 = arith.constant 0 : index
    %c0_4 = arith.constant 0 : index
    %7 = vector.load %arg3[%c0_3, %c0_4] : memref<1x32xf32, #tpu.memory_space<vmem>>, vector<1x32xf32>
    %8 = vector.broadcast %6 : vector<4x1xf32> to vector<4x32xf32>
    %9 = vector.broadcast %7 : vector<1x32xf32> to vector<4x32xf32>
    %10 = arith.mulf %8, %9 : vector<4x32xf32>
    %c0_5 = arith.constant 0 : index
    %c0_6 = arith.constant 0 : index
    %11 = vector.load %arg4[%c0_5, %c0_6] : memref<1x32xf32, #tpu.memory_space<vmem>>, vector<1x32xf32>
    %12 = vector.broadcast %11 : vector<1x32xf32> to vector<4x32xf32>
    %13 = arith.addf %10, %12 : vector<4x32xf32>
    %c0_7 = arith.constant 0 : index
    %c0_8 = arith.constant 0 : index
    %14 = vector.load %arg2[%c0_7, %c0_8] : memref<4x1xi32, #tpu.memory_space<vmem>>, vector<4x1xi32>
    %c0_i32 = arith.constant 0 : i32
    %15 = vector.broadcast %c0_i32 : i32 to vector<4x1xi32>
    %16 = arith.cmpi ne, %14, %15 : vector<4x1xi32>
    %17 = vector.shape_cast %16 : vector<4x1xi1> to vector<4x1xi1>
    %18 = vector.broadcast %17 : vector<4x1xi1> to vector<4x32xi1>
    %19 = arith.select %18, %13, %5 : vector<4x32xi1>, vector<4x32xf32>
    %c0_9 = arith.constant 0 : index
    %c0_10 = arith.constant 0 : index
    %20 = vector.load %arg6[%c0_9, %c0_10] : memref<1x16xf32, #tpu.memory_space<vmem>>, vector<1x16xf32>
    %21 = vector.extract_strided_slice %19 {offsets = [0, 0], sizes = [1, 32], strides = [1, 1]} : vector<4x32xf32> to vector<1x32xf32>
    %c0_11 = arith.constant 0 : index
    %c0_12 = arith.constant 0 : index
    %c0_13 = arith.constant 0 : index
    %22 = vector.load %arg5[%c0_11, %c0_12, %c0_13] : memref<4x32x16xf32, #tpu.memory_space<vmem>>, vector<1x32x16xf32>
    %23 = vector.shape_cast %22 : vector<1x32x16xf32> to vector<32x16xf32>
    %cst = arith.constant dense<0.000000e+00> : vector<1x16xf32>
    %24 = tpu.matmul %21, %23, %cst {dimension_numbers = #tpu.dot_dimension_numbers<[1], [0], [0], [1], [0, 0, 1, 1], [], []>} : vector<1x32xf32>, vector<32x16xf32>, vector<1x16xf32> -> vector<1x16xf32>
    %25 = arith.addf %20, %24 : vector<1x16xf32>
    %26 = vector.extract_strided_slice %19 {offsets = [1, 0], sizes = [1, 32], strides = [1, 1]} : vector<4x32xf32> to vector<1x32xf32>
    %c1 = arith.constant 1 : index
    %c0_14 = arith.constant 0 : index
    %c0_15 = arith.constant 0 : index
    %27 = vector.load %arg5[%c1, %c0_14, %c0_15] : memref<4x32x16xf32, #tpu.memory_space<vmem>>, vector<1x32x16xf32>
    %28 = vector.shape_cast %27 : vector<1x32x16xf32> to vector<32x16xf32>
    %cst_16 = arith.constant dense<0.000000e+00> : vector<1x16xf32>
    %29 = tpu.matmul %26, %28, %cst_16 {dimension_numbers = #tpu.dot_dimension_numbers<[1], [0], [0], [1], [0, 0, 1, 1], [], []>} : vector<1x32xf32>, vector<32x16xf32>, vector<1x16xf32> -> vector<1x16xf32>
    %30 = arith.addf %25, %29 : vector<1x16xf32>
    %31 = vector.extract_strided_slice %19 {offsets = [2, 0], sizes = [1, 32], strides = [1, 1]} : vector<4x32xf32> to vector<1x32xf32>
    %c2 = arith.constant 2 : index
    %c0_17 = arith.constant 0 : index
    %c0_18 = arith.constant 0 : index
    %32 = vector.load %arg5[%c2, %c0_17, %c0_18] : memref<4x32x16xf32, #tpu.memory_space<vmem>>, vector<1x32x16xf32>
    %33 = vector.shape_cast %32 : vector<1x32x16xf32> to vector<32x16xf32>
    %cst_19 = arith.constant dense<0.000000e+00> : vector<1x16xf32>
    %34 = tpu.matmul %31, %33, %cst_19 {dimension_numbers = #tpu.dot_dimension_numbers<[1], [0], [0], [1], [0, 0, 1, 1], [], []>} : vector<1x32xf32>, vector<32x16xf32>, vector<1x16xf32> -> vector<1x16xf32>
    %35 = arith.addf %30, %34 : vector<1x16xf32>
    %36 = vector.extract_strided_slice %19 {offsets = [3, 0], sizes = [1, 32], strides = [1, 1]} : vector<4x32xf32> to vector<1x32xf32>
    %c3 = arith.constant 3 : index
    %c0_20 = arith.constant 0 : index
    %c0_21 = arith.constant 0 : index
    %37 = vector.load %arg5[%c3, %c0_20, %c0_21] : memref<4x32x16xf32, #tpu.memory_space<vmem>>, vector<1x32x16xf32>
    %38 = vector.shape_cast %37 : vector<1x32x16xf32> to vector<32x16xf32>
    %cst_22 = arith.constant dense<0.000000e+00> : vector<1x16xf32>
    %39 = tpu.matmul %36, %38, %cst_22 {dimension_numbers = #tpu.dot_dimension_numbers<[1], [0], [0], [1], [0, 0, 1, 1], [], []>} : vector<1x32xf32>, vector<32x16xf32>, vector<1x16xf32> -> vector<1x16xf32>
    %40 = arith.addf %35, %39 : vector<1x16xf32>
    %cst_23 = arith.constant 0.000000e+00 : f32
    %41 = vector.broadcast %cst_23 : f32 to vector<1x16xf32>
    %42 = arith.maximumf %40, %41 : vector<1x16xf32>
    %c0_24 = arith.constant 0 : index
    %c0_25 = arith.constant 0 : index
    %43 = vector.load %arg7[%c0_24, %c0_25] : memref<16x8xf32, #tpu.memory_space<vmem>>, vector<16x8xf32>
    %cst_26 = arith.constant dense<0.000000e+00> : vector<1x8xf32>
    %44 = tpu.matmul %42, %43, %cst_26 {dimension_numbers = #tpu.dot_dimension_numbers<[1], [0], [0], [1], [0, 0, 1, 1], [], []>} : vector<1x16xf32>, vector<16x8xf32>, vector<1x8xf32> -> vector<1x8xf32>
    %c0_27 = arith.constant 0 : index
    %c0_28 = arith.constant 0 : index
    %45 = vector.load %arg8[%c0_27, %c0_28] : memref<1x8xf32, #tpu.memory_space<vmem>>, vector<1x8xf32>
    %46 = arith.addf %44, %45 : vector<1x8xf32>
    %c0_29 = arith.constant 0 : index
    %c0_30 = arith.constant 0 : index
    %47 = vector.load %arg9[%c0_29, %c0_30] : memref<1x8xf32, #tpu.memory_space<vmem>>, vector<1x8xf32>
    tpu.vector_store %arg9[%c0_29, %c0_30], %46 {strides = array<i32>} : memref<1x8xf32, #tpu.memory_space<vmem>>, vector<1x8xf32>,
    return
  }
}

</mosaic_0001>

<bundles_post_ra>
// kernel: tpu_custom_call.1
= control target key start
LH: loop header
LB: loop body
LE: loop exit
PB: predicated region body
PF: predicated region fallthrough
CT: control target
= control target key end

     0   :  { %v641_v1 = vmov 0   ;;  %v642_v6 = vmov 0.0|0.0   ;;  %s801_s0 = inlined_call_operand.vmem [shape: s32[4,1], index: 0, kind: input, shape index: {}]   ;;  %s802_s1 = inlined_call_operand.vmem [shape: f32[4,1], index: 1, kind: input, shape index: {}]   ;;  %s803_s2 = inlined_call_operand.vmem [shape: s32[4,1], index: 2, kind: input, shape index: {}]   ;;  %s804_s3 = inlined_call_operand.vmem [shape: f32[1,32], index: 3, kind: input, shape index: {}]   ;;  %s805_s4 = inlined_call_operand.vmem [shape: f32[1,32], index: 4, kind: input, shape index: {}]   ;;  %s806_s5 = inlined_call_operand.vmem [shape: f32[4,32,16], index: 5, kind: input, shape index: {}]   ;;  %s807_s6 = inlined_call_operand.vmem [shape: f32[1,16], index: 6, kind: input, shape index: {}]   ;;  %s808_s7 = inlined_call_operand.vmem [shape: f32[16,8], index: 7, kind: input, shape index: {}]   ;;  %s809_s8 = inlined_call_operand.vmem [shape: f32[1,8], index: 8, kind: input, shape index: {}]   ;;  %s810_s9 = inlined_call_operand.hbm [shape: f32[1,8], index: 9, kind: output, shape index: {}]  }
   0x1   :  { %v42_v0 = vld [vmem:[%s802_s1] sm:$0xf]  ;;  %615 = vset.pattern.permute.xlu0 %v641_v1  ;;  %616 = vset.pattern.permute.xlu1 %v641_v1  ;;  %v74_v4 = vld [vmem:[%s806_s5 + $0x8] sm:$0xff]  ;;  %v75_v11 = vld [vmem:[%s806_s5 + $0x10] sm:$0xff] }
   0x2   :  { %v64_v2 = vld [vmem:[%s803_s2] sm:$0xf]  ;;  %46 = vperm.xlu0 %615, %v42_v0   ;;  %577 = vmatprep.subr.bf16.mxu1 %v642_v6  ;;  %v493_v10 = vld [vmem:[%s806_s5 + $0x48] sm:$0xff]  ;;  %v76_v12 = vld [vmem:[%s806_s5 + $0x18] sm:$0xff] }
   0x3   :  { %v73_v3 = vld [vmem:[%s806_s5] sm:$0xff]  ;;  %vm65_vm0 = vcmp.ne.s32.totalorder %v64_v2, 0  ;;  %589 = vmatprep.subr.bf16.mxu0 %v642_v6  ;;  %v581_v14 = vpack.c.bf16 %v76_v12, %v75_v11 }
   0x4   :  { %v35_v5 = vld [vmem:[%s801_s0] sm:$0xf]  ;;  %v578_v7 = vpack.c.bf16 %v74_v4, %v73_v3  ;;  %v66_v9 = vsel %vm65_vm0, 1, %v641_v1 }
   0x5   :  { %v492_v8 = vld [vmem:[%s806_s5 + $0x40] sm:$0xff]  ;;  %68 = vperm.xlu1 %616, %v66_v9  }
   0x6   :  { %579 = vmatpush3.bf16.msra.mxu1 %v578_v7  ;;  %v590_v13 = vpack.c.bf16 %v493_v10, %v492_v8 }
   0x7   :  { %14 = vsyncpa [#allocation3], 0  ;;  %580 = vmatprep.subr.bf16.mxu1 %v642_v6  ;;  %v494_v15 = vld [vmem:[%s806_s5 + $0x50] sm:$0xff]  ;;  %v495_v16 = vld [vmem:[%s806_s5 + $0x58] sm:$0xff]  ;;  %37 = vperm.xlu0 %615, %v35_v5   ;;  %vm643_vm1 = vmmov 0   ;;  %v644_v18 = vmov 0.0   ;;  %v33_v19 = vlaneseq }
   0x8   :  { %591 = vmatpush3.bf16.msra.mxu0 %v590_v13  ;;  %v593_v17 = vpack.c.bf16 %v495_v16, %v494_v15  ;;  %534 = vmatprep.mubr.msk.f32.mxu1 %vm643_vm1, %v644_v18  ;;  %v484_v20 = vld [vmem:[%s804_s3] ss:$0 sm:$0xff]  ;;  %v488_v27 = vld [vmem:[%s806_s5 + $0x28] sm:$0xff]  ;;  %vm77_vm4 = vcmask 261120   ;;  %v489_v34 = vld [vmem:[%s806_s5 + $0x30] sm:$0xff]  ;;  %vm393_vm5 = vcmask 130048  }
   0x9   :  { %592 = vmatprep.subr.bf16.mxu0 %v642_v6  ;;  %556 = vmatprep.mubr.msk.f32.mxu0 %vm643_vm1, %v644_v18  ;;  %v34_v23 = vand.u32 127, %v33_v19  ;;  %v485_v24 = vld [vmem:[%s805_s4] ss:$0 sm:$0xff]  ;;  %v498_v30 = vld [vmem:[%s806_s5 + $0x68] sm:$0xff]  ;;  %v490_v35 = vld [vmem:[%s806_s5 + $0x38] sm:$0xff]  ;;  %vm467_vm6 = vcmask 57344  }
   0xa   :  { %582 = vmatpush3.bf16.msra.mxu1 %v581_v14  ;;  %v487_v26 = vld [vmem:[%s806_s5 + $0x20] sm:$0xff]  ;;  %v499_v39 = vld [vmem:[%s806_s5 + $0x70] sm:$0xff]  ;;  %v500_v40 = vld [vmem:[%s806_s5 + $0x78] sm:$0xff]  ;;  %v587_v41 = vpack.c.bf16 %v490_v35, %v489_v34 }
   0xb   :  { %583 = vmatprep.subr.bf16.mxu1 %v642_v6  ;;  %v497_v29 = vld [vmem:[%s806_s5 + $0x60] sm:$0xff]  ;;  %v584_v32 = vpack.c.bf16 %v488_v27, %v487_v26  ;;  %v599_v42 = vpack.c.bf16 %v500_v40, %v499_v39  ;;  %v391_v46 = vld [vmem:[%s808_s7 + $0x8] sm:$0xff] }
   0xc   :  { %594 = vmatpush3.bf16.msra.mxu0 %v593_v17  ;;  %v596_v37 = vpack.c.bf16 %v498_v30, %v497_v29  ;;  %v390_v45 = vld [vmem:[%s808_s7] sm:$0xff]  ;;  %s645_s7 = smov [#allocation2]  }
   0xd   :  { %595 = vmatprep.subr.bf16.mxu0 %v642_v6  ;;  %v602_v47 = vpack.c.bf16 %v391_v46, %v390_v45  ;;  %v72_v48 = vld [vmem:[%s807_s6] sm:$0x1]  ;;  %s475_s29 = sshll.u32 %s645_s7, 4  ;;  %s476_s29 = int_to_ptr.vmem [resolvable:$true] %s475_s29 }
   0xe   :  { %v392_v56 = vld [vmem:[%s809_s8] sm:$0x1]  ;;  %s617_s6 = scalar_lea.vmem %s476_s29, 16  ;;  %s621_s30 = scalar_lea.vmem %s476_s29, 32 }
   0xf   :  { %p618_p0 = scmp.ne.s32.totalorder %s476_s29, %s617_s6  ;;  %p622_p1 = scmp.lt.s32.totalorder %s476_s29, %s476_s29 }
  0x10   :  { %p623_p2 = scmp.lt.s32.totalorder %s621_s30, %s617_s6 }
  0x12   :  { %p624_p3 = por %p623_p2, %p622_p1 }
  0x14   :  { %p625_p4 = pnand %p624_p3, %p618_p0 }
  0x81   :  { %v47_v21 = vpop.permute.xlu0 %46 }
  0x82   :  { %v55_v22 = vmul.f32 %v484_v20, %v47_v21 }
  0x84   :  { %v69_v25 = vpop.permute.xlu1 %68  ;;  %v63_v31 = vadd.f32 %v485_v24, %v55_v22 }
  0x85   :  { %vm70_vm2 = vcmp.eq.s32.totalorder %v69_v25, 1 }
  0x86   :  { %v38_v28 = vpop.permute.xlu0 %37 }
  0x87   :  { %vm39_vm3 = vcmp.eq.s32.totalorder %v34_v23, %v38_v28 }
  0x88   :  { %v483_v33 = vsel %vm39_vm3, 1.0, %v644_v18 }
  0x89   :  { %v71_v36 = vsel %vm70_vm2, %v63_v31, %v483_v33 }
  0x8a   :  { %v236_v38 = vrot.slane %v71_v36, 2  ;;  %535 = vmatmul.mubr.msk.f32.vlgmr.msra.gmra.mrb[0].mxu1 %vm77_vm4, %v71_v36  ;;  %v157_v43 = vrot.slane %v71_v36, 1  ;;  %v315_v44 = vrot.slane %v71_v36, 3 }
  0x8b   :  { %585 = vmatpush3.bf16.msra.mxu1 %v584_v32  ;;  %545 = vmatprep.mubr.msk.f32.mxu1 %vm643_vm1, %v644_v18 }
  0x8c   :  { %557 = vmatmul.mubr.msk.f32.vlgmr.msra.gmra.mrb[0].mxu0 %vm77_vm4, %v236_v38  ;;  %586 = vmatprep.subr.bf16.mxu1 %v642_v6 }
  0x8d   :  { %597 = vmatpush3.bf16.msra.mxu0 %v596_v37  ;;  %567 = vmatprep.mubr.msk.f32.mxu0 %vm643_vm1, %v644_v18 }
  0x8e   :  { %598 = vmatprep.subr.bf16.mxu0 %v642_v6 }
  0x8f   :  { %588 = vmatpush3.bf16.msra.mxu1 %v587_v41 }
  0x90   :  { %601 = vmatprep.subr.bf16.mxu1 %v642_v6 }
  0x91   :  { %600 = vmatpush3.bf16.msra.mxu0 %v599_v42 }
  0x92   :  { %546 = vmatmul.mubr.msk.f32.vlgmr.msra.gmra.mrb[0].mxu1 %vm77_vm4, %v157_v43 }
  0x93   :  { %574 = vmatprep.mubr.msk.f32.mxu1 %vm643_vm1, %v644_v18  ;;  %603 = vmatpush3.bf16.msra.mxu1 %v602_v47 }
  0x94   :  { %568 = vmatmul.mubr.msk.f32.vlgmr.msra.gmra.mrb[0].mxu0 %vm77_vm4, %v315_v44 }
 0x165   :  { %v226_v49 = vpop.f32.mrb[0].mxu1 }
 0x166   :  { %v604_v50 = vadd.f32 %v226_v49, %v72_v48  ;;  %v547_v51 = vpop.f32.mrb[1].mxu1 }
 0x167   :  { %v384_v52 = vpop.f32.mrb[0].mxu0 }
 0x168   :  { %v605_v53 = vadd.f32 %v604_v50, %v384_v52  ;;  %v569_v54 = vpop.f32.mrb[1].mxu0 }
 0x16a   :  { %v389_v55 = vmax.f32 %v605_v53, 0.0 }
 0x16c   :  { %575 = vmatmul.mubr.msk.f32.vlgmr.msra.gmra.mrb[2].mxu1 %vm393_vm5, %v389_v55 }
 0x23f   :  { %v463_v57 = vpop.f32.mrb[2].mxu1 }
 0x240   :  { %v464_v58 = vadd.f32 %v463_v57, %v392_v56  ;;  %v576_v59 = vpop.f32.mrb[3].mxu1 }
 0x242   :  { %468 = vst.msk [vmem:[#allocation2] sm:$0x1] %vm467_vm6, %v464_v58 }
 0x243   :  { %628 = shalt.err (!%p625_p4)
}
 0x244   :  { %s629_s8 = scalar_lea.hbm %s810_s9, 16 }
 0x245   :  { %p630_p5 = scmp.ne.s32.totalorder %s810_s9, %s629_s8  ;;  %p633_p6 = scmp.lt.u32.totalorder %s629_s8, %s810_s9 }
 0x247   :  { %p635_p7 = pnand %p633_p6, %p630_p5 }
 0x249   :  { %638 = shalt.err (!%p635_p7)
}
 0x24a   :  { %478 = dma.vmem_to_hbm [thread:$0]  %s476_s29, 16, %s810_s9, [#allocation3]  }
 0x24b   :  { %639 = dma.done.wait [#allocation3], 16  }
 0x24c   :  { %640 = vsyncadd [#allocation3], 4294967280 }
 0x24d   :  { %482 = vsyncpa [#allocation3], 1 }

</bundles_post_ra>
